<compile_context>
chip_gen: v7x
topology: tpu7x:2x2x1
jax: 0.10.0
libtpu: 0.0.40
codegen_flags: <defaults>
</compile_context>

<pallas_src>
import jax
import jax.numpy as jnp
from jax.experimental import pallas as pl
from jax.experimental.pallas import tpu as pltpu


# Architecture constants (from the PyTorch module).
H1 = 256          # layer-1 width per Q-net
H2 = 64           # layer-2 width per Q-net
H3 = 16           # layer-3 width per Q-net
LANE = 128        # lane-dense width for layers 2-4 outputs and final output


# ----------------------------------------------------------------------------
# Kernel: fused dual-Q MLP.  bf16 MXU inputs, f32 accumulation / bias / ReLU.
# ----------------------------------------------------------------------------
def _fused_critic_kernel(x_ref,
                         w1_ref, b1_ref,
                         w2_ref, b2_ref,
                         w3_ref, b3_ref,
                         w4_ref, b4_ref,
                         o_ref):
    f32 = jnp.float32
    bf16 = jnp.bfloat16

    x = x_ref[...].astype(bf16)                                          # (TB, D)

    # Layer 1: both Q-nets packed on lanes 0-255 / 256-511.
    h1 = jnp.dot(x, w1_ref[...], preferred_element_type=f32) + b1_ref[...]
    h1 = jnp.maximum(h1, 0.0).astype(bf16)                               # (TB, 512)

    # Layer 2: block-diag (512,128); q1 -> lanes 0-63, q2 -> lanes 64-127.
    h2 = jnp.dot(h1, w2_ref[...], preferred_element_type=f32) + b2_ref[...]
    h2 = jnp.maximum(h2, 0.0).astype(bf16)                               # (TB, 128)

    # Layer 3: block-diag (128,128); q1 -> lanes 0-15, q2 -> lanes 16-31.
    h3 = jnp.dot(h2, w3_ref[...], preferred_element_type=f32) + b3_ref[...]
    h3 = jnp.maximum(h3, 0.0).astype(bf16)                               # (TB, 128)

    # Layer 4: (128,128); q1 -> lane 0, q2 -> lane 1, other lanes exactly zero.
    out = jnp.dot(h3, w4_ref[...], preferred_element_type=f32) + b4_ref[...]
    o_ref[...] = out.astype(o_ref.dtype)                                 # (TB, 128)


# ----------------------------------------------------------------------------
# Parameter init (mimics torch.nn.Linear default) and dual-net packing.
# ----------------------------------------------------------------------------
def _init_linear(key, fan_in, fan_out):
    kw, kb = jax.random.split(key)
    bound = 1.0 / jnp.sqrt(jnp.float32(fan_in))
    w = jax.random.uniform(kw, (fan_in, fan_out), jnp.float32, -bound, bound)
    b = jax.random.uniform(kb, (1, fan_out), jnp.float32, -bound, bound)
    return w, b


def init_critic_params(key, state_dim, action_T_dim, action_R_dim):
    in_dim = state_dim + action_T_dim + action_R_dim
    dims = [in_dim, H1, H2, H3, 1]
    keys = jax.random.split(key, 2 * (len(dims) - 1))
    q1, q2 = [], []
    for i in range(len(dims) - 1):
        q1.append(_init_linear(keys[2 * i], dims[i], dims[i + 1]))
        q2.append(_init_linear(keys[2 * i + 1], dims[i], dims[i + 1]))
    return q1, q2


def pack_critic_params(q1_params, q2_params):
    """One-time packing of the two Q-nets into tight lane-packed / block-diag
    bf16 weights (biases stay f32; they are added to the f32 accumulator)."""
    (w1a, b1a), (w2a, b2a), (w3a, b3a), (w4a, b4a) = q1_params
    (w1b, b1b), (w2b, b2b), (w3b, b3b), (w4b, b4b) = q2_params
    f32, bf16 = jnp.float32, jnp.bfloat16

    # Layer 1: (D, 512) — q1 on lanes 0-255, q2 on lanes 256-511.
    w1 = jnp.concatenate([w1a, w1b], axis=1).astype(bf16)
    b1 = jnp.concatenate([b1a, b1b], axis=1).astype(f32)                 # (1, 512)

    # Layer 2: (512, 128) block-diag — q1 rows 0-255 -> lanes 0-63,
    #                                  q2 rows 256-511 -> lanes 64-127.
    w2 = jnp.zeros((2 * H1, 2 * H2), f32)
    w2 = w2.at[:H1, :H2].set(w2a).at[H1:, H2:].set(w2b).astype(bf16)
    b2 = jnp.concatenate([b2a, b2b], axis=1).astype(f32)                 # (1, 128)

    # Layer 3: (128, 128) block-diag — q1 rows 0-63 -> lanes 0-15,
    #                                  q2 rows 64-127 -> lanes 16-31, rest zero.
    w3 = jnp.zeros((2 * H2, LANE), f32)
    w3 = w3.at[:H2, :H3].set(w3a).at[H2:, H3:2 * H3].set(w3b).astype(bf16)
    b3 = jnp.zeros((1, LANE), f32)
    b3 = b3.at[:, :H3].set(b1a[:, :0].dtype.type(0) + b3a).at[:, H3:2 * H3].set(b3b)

    # Layer 4: (128, 128) — q1 rows 0-15 -> lane 0, q2 rows 16-31 -> lane 1.
    w4 = jnp.zeros((LANE, LANE), f32)
    w4 = w4.at[:H3, 0:1].set(w4a).at[H3:2 * H3, 1:2].set(w4b).astype(bf16)
    b4 = jnp.zeros((1, LANE), f32)
    b4 = b4.at[0, 0].set(b4a[0, 0]).at[0, 1].set(b4b[0, 0])

    return (w1, b1, w2, b2, w3, b3, w4, b4)


# ----------------------------------------------------------------------------
# Forward wrapper: single fused pallas_call for both Q-heads.
# ----------------------------------------------------------------------------
@jax.jit
def critic_forward(state, action_T, action_R, packed_params):
    w1, b1, w2, b2, w3, b3, w4, b4 = packed_params

    # Tiny (B, D) concat: one dot + one input pipeline instead of three.
    x = jnp.concatenate([state, action_T, action_R], axis=1)
    B, D = x.shape

    # Batch tiling: single tile for small B; for large B keep >=2 grid steps
    # (v7x megacore) with TB a multiple of 8, capped at 1024 so the working set
    # stays far inside v5e's 16 MiB scoped-VMEM default (and v7x's 64 MiB VMEM).
    if B <= 512:
        TB = B
    else:
        TB = min(1024, ((pl.cdiv(B, 2)) + 7) // 8 * 8)
    grid = (pl.cdiv(B, TB),)

    def const_spec(a):
        return pl.BlockSpec(a.shape, lambda i: (0, 0))

    # Truthful (unpadded) cost for XLA's scheduler.
    real_flops = 2 * B * 2 * (D * H1 + H1 * H2 + H2 * H3 + H3 * 1)
    weight_bytes = sum(int(a.size) * a.dtype.itemsize for a in packed_params)
    bytes_accessed = int(x.size) * 4 + weight_bytes + B * 2 * 4
    cost = pl.CostEstimate(flops=real_flops, transcendentals=0,
                           bytes_accessed=bytes_accessed)

    out = pl.pallas_call(
        _fused_critic_kernel,
        out_shape=jax.ShapeDtypeStruct((B, LANE), jnp.float32),
        grid=grid,
        in_specs=[
            pl.BlockSpec((TB, D), lambda i: (i, 0)),
            const_spec(w1), const_spec(b1),
            const_spec(w2), const_spec(b2),
            const_spec(w3), const_spec(b3),
            const_spec(w4), const_spec(b4),
        ],
        out_specs=pl.BlockSpec((TB, LANE), lambda i: (i, 0)),
        compiler_params=pltpu.CompilerParams(
            dimension_semantics=("parallel",)),
        cost_estimate=cost,
    )(x, w1, b1, w2, b2, w3, b3, w4, b4)

    # Lane-dense (B, 128) output; the two Q-values live in lanes 0 and 1.
    q12 = out[:, :2]
    return q12[:, 0:1], q12[:, 1:2]


# ----------------------------------------------------------------------------
# Pure-JAX f32 reference (uses the original, unpacked per-net parameters).
# ----------------------------------------------------------------------------
def critic_reference(state, action_T, action_R, q1_params, q2_params):
    x = jnp.concatenate([state, action_T, action_R], axis=1)

    def mlp(x, params):
        h = x
        for i, (w, b) in enumerate(params):
            h = h @ w + b
            if i < len(params) - 1:
                h = jnp.maximum(h, 0.0)
        return h

    return mlp(x, q1_params), mlp(x, q2_params)


if __name__ == "__main__":
    B = 8
    state_dim, action_T_dim, action_R_dim = 16, 8, 8

    key = jax.random.PRNGKey(0)
    k_state, k_aT, k_aR, k_params = jax.random.split(key, 4)

    state = jax.random.normal(k_state, (B, state_dim), jnp.float32)
    action_T = jax.random.normal(k_aT, (B, action_T_dim), jnp.float32)
    action_R = jax.random.normal(k_aR, (B, action_R_dim), jnp.float32)

    q1_params, q2_params = init_critic_params(
        k_params, state_dim, action_T_dim, action_R_dim)
    packed = pack_critic_params(q1_params, q2_params)

    q1, q2 = critic_forward(state, action_T, action_R, packed)
    jax.block_until_ready((q1, q2))

    q1_ref, q2_ref = critic_reference(state, action_T, action_R,
                                      q1_params, q2_params)
    assert q1.shape == (B, 1) and q2.shape == (B, 1)
    # bf16 weights/activations vs f32 reference -> loosened tolerance.
    assert jnp.allclose(q1, q1_ref, atol=2e-2, rtol=2e-2)
    assert jnp.allclose(q2, q2_ref, atol=2e-2, rtol=2e-2)

    print("KERNEL_OK")
</pallas_src>

<mosaic_0001>
module attributes {stable_mosaic.version = 11 : i64} {
  func.func @_fused_critic_kernel(%arg0: i32, %arg1: memref<8x32xf32, #tpu.memory_space<vmem>>, %arg2: memref<32x512xbf16, #tpu.memory_space<vmem>>, %arg3: memref<1x512xf32, #tpu.memory_space<vmem>>, %arg4: memref<512x128xbf16, #tpu.memory_space<vmem>>, %arg5: memref<1x128xf32, #tpu.memory_space<vmem>>, %arg6: memref<128x128xbf16, #tpu.memory_space<vmem>>, %arg7: memref<1x128xf32, #tpu.memory_space<vmem>>, %arg8: memref<128x128xbf16, #tpu.memory_space<vmem>>, %arg9: memref<1x128xf32, #tpu.memory_space<vmem>>, %arg10: memref<8x128xf32, #tpu.memory_space<vmem>>) attributes {dimension_semantics = [#tpu.dimension_semantics<parallel>], iteration_bounds = array<i64: 1>, scalar_prefetch = 0 : i64, scratch_operands = 0 : i64, tpu.core_type = #tpu.core_type<tc>, window_params = [{transform_indices = @transform_0, window_bounds = array<i64: 8, 32>}, {pipeline_mode = #tpu.pipeline_mode<synchronous>, transform_indices = @transform_1, window_bounds = array<i64: 32, 512>}, {pipeline_mode = #tpu.pipeline_mode<synchronous>, transform_indices = @transform_2, window_bounds = array<i64: 1, 512>}, {pipeline_mode = #tpu.pipeline_mode<synchronous>, transform_indices = @transform_3, window_bounds = array<i64: 512, 128>}, {pipeline_mode = #tpu.pipeline_mode<synchronous>, transform_indices = @transform_4, window_bounds = array<i64: 1, 128>}, {pipeline_mode = #tpu.pipeline_mode<synchronous>, transform_indices = @transform_5, window_bounds = array<i64: 128, 128>}, {pipeline_mode = #tpu.pipeline_mode<synchronous>, transform_indices = @transform_6, window_bounds = array<i64: 1, 128>}, {pipeline_mode = #tpu.pipeline_mode<synchronous>, transform_indices = @transform_7, window_bounds = array<i64: 128, 128>}, {pipeline_mode = #tpu.pipeline_mode<synchronous>, transform_indices = @transform_8, window_bounds = array<i64: 1, 128>}, {transform_indices = @transform_9, window_bounds = array<i64: 8, 128>}]} {
    %c0 = arith.constant 0 : index
    %c0_0 = arith.constant 0 : index
    %0 = vector.load %arg1[%c0, %c0_0] : memref<8x32xf32, #tpu.memory_space<vmem>>, vector<8x32xf32>
    %1 = arith.truncf %0 : vector<8x32xf32> to vector<8x32xbf16>
    %c0_1 = arith.constant 0 : index
    %c0_2 = arith.constant 0 : index
    %2 = vector.load %arg2[%c0_1, %c0_2] : memref<32x512xbf16, #tpu.memory_space<vmem>>, vector<32x512xbf16>
    %cst = arith.constant dense<0.000000e+00> : vector<8x512xf32>
    %3 = tpu.matmul %1, %2, %cst {dimension_numbers = #tpu.dot_dimension_numbers<[1], [0], [0], [1], [0, 0, 1, 1], [], []>} : vector<8x32xbf16>, vector<32x512xbf16>, vector<8x512xf32> -> vector<8x512xf32>
    %c0_3 = arith.constant 0 : index
    %c0_4 = arith.constant 0 : index
    %4 = vector.load %arg3[%c0_3, %c0_4] : memref<1x512xf32, #tpu.memory_space<vmem>>, vector<1x512xf32>
    %5 = vector.broadcast %4 : vector<1x512xf32> to vector<8x512xf32>
    %6 = arith.addf %3, %5 : vector<8x512xf32>
    %cst_5 = arith.constant 0.000000e+00 : f32
    %7 = vector.broadcast %cst_5 : f32 to vector<8x512xf32>
    %8 = arith.maximumf %6, %7 : vector<8x512xf32>
    %9 = arith.truncf %8 : vector<8x512xf32> to vector<8x512xbf16>
    %c0_6 = arith.constant 0 : index
    %c0_7 = arith.constant 0 : index
    %10 = vector.load %arg4[%c0_6, %c0_7] : memref<512x128xbf16, #tpu.memory_space<vmem>>, vector<512x128xbf16>
    %cst_8 = arith.constant dense<0.000000e+00> : vector<8x128xf32>
    %11 = tpu.matmul %9, %10, %cst_8 {dimension_numbers = #tpu.dot_dimension_numbers<[1], [0], [0], [1], [0, 0, 1, 1], [], []>} : vector<8x512xbf16>, vector<512x128xbf16>, vector<8x128xf32> -> vector<8x128xf32>
    %c0_9 = arith.constant 0 : index
    %c0_10 = arith.constant 0 : index
    %12 = vector.load %arg5[%c0_9, %c0_10] : memref<1x128xf32, #tpu.memory_space<vmem>>, vector<1x128xf32>
    %13 = vector.broadcast %12 : vector<1x128xf32> to vector<8x128xf32>
    %14 = arith.addf %11, %13 : vector<8x128xf32>
    %cst_11 = arith.constant 0.000000e+00 : f32
    %15 = vector.broadcast %cst_11 : f32 to vector<8x128xf32>
    %16 = arith.maximumf %14, %15 : vector<8x128xf32>
    %17 = arith.truncf %16 : vector<8x128xf32> to vector<8x128xbf16>
    %c0_12 = arith.constant 0 : index
    %c0_13 = arith.constant 0 : index
    %18 = vector.load %arg6[%c0_12, %c0_13] : memref<128x128xbf16, #tpu.memory_space<vmem>>, vector<128x128xbf16>
    %cst_14 = arith.constant dense<0.000000e+00> : vector<8x128xf32>
    %19 = tpu.matmul %17, %18, %cst_14 {dimension_numbers = #tpu.dot_dimension_numbers<[1], [0], [0], [1], [0, 0, 1, 1], [], []>} : vector<8x128xbf16>, vector<128x128xbf16>, vector<8x128xf32> -> vector<8x128xf32>
    %c0_15 = arith.constant 0 : index
    %c0_16 = arith.constant 0 : index
    %20 = vector.load %arg7[%c0_15, %c0_16] : memref<1x128xf32, #tpu.memory_space<vmem>>, vector<1x128xf32>
    %21 = vector.broadcast %20 : vector<1x128xf32> to vector<8x128xf32>
    %22 = arith.addf %19, %21 : vector<8x128xf32>
    %cst_17 = arith.constant 0.000000e+00 : f32
    %23 = vector.broadcast %cst_17 : f32 to vector<8x128xf32>
    %24 = arith.maximumf %22, %23 : vector<8x128xf32>
    %25 = arith.truncf %24 : vector<8x128xf32> to vector<8x128xbf16>
    %c0_18 = arith.constant 0 : index
    %c0_19 = arith.constant 0 : index
    %26 = vector.load %arg8[%c0_18, %c0_19] : memref<128x128xbf16, #tpu.memory_space<vmem>>, vector<128x128xbf16>
    %cst_20 = arith.constant dense<0.000000e+00> : vector<8x128xf32>
    %27 = tpu.matmul %25, %26, %cst_20 {dimension_numbers = #tpu.dot_dimension_numbers<[1], [0], [0], [1], [0, 0, 1, 1], [], []>} : vector<8x128xbf16>, vector<128x128xbf16>, vector<8x128xf32> -> vector<8x128xf32>
    %c0_21 = arith.constant 0 : index
    %c0_22 = arith.constant 0 : index
    %28 = vector.load %arg9[%c0_21, %c0_22] : memref<1x128xf32, #tpu.memory_space<vmem>>, vector<1x128xf32>
    %29 = vector.broadcast %28 : vector<1x128xf32> to vector<8x128xf32>
    %30 = arith.addf %27, %29 : vector<8x128xf32>
    %c0_23 = arith.constant 0 : index
    %c0_24 = arith.constant 0 : index
    %31 = vector.load %arg10[%c0_23, %c0_24] : memref<8x128xf32, #tpu.memory_space<vmem>>, vector<8x128xf32>
    tpu.vector_store %arg10[%c0_23, %c0_24], %30 {strides = array<i32>} : memref<8x128xf32, #tpu.memory_space<vmem>>, vector<8x128xf32>,
    return
  }
  func.func @transform_0(%arg0: i32) -> (i32, i32) {
    %c0_i32 = arith.constant 0 : i32
    %c0_i32_0 = arith.constant 0 : i32
    return %arg0, %c0_i32 : i32, i32
  }
  func.func @transform_1(%arg0: i32) -> (i32, i32) {
    %c0_i32 = arith.constant 0 : i32
    %c0_i32_0 = arith.constant 0 : i32
    %c0_i32_1 = arith.constant 0 : i32
    return %c0_i32, %c0_i32_0 : i32, i32
  }
  func.func @transform_2(%arg0: i32) -> (i32, i32) {
    %c0_i32 = arith.constant 0 : i32
    %c0_i32_0 = arith.constant 0 : i32
    %c0_i32_1 = arith.constant 0 : i32
    return %c0_i32, %c0_i32_0 : i32, i32
  }
  func.func @transform_3(%arg0: i32) -> (i32, i32) {
    %c0_i32 = arith.constant 0 : i32
    %c0_i32_0 = arith.constant 0 : i32
    %c0_i32_1 = arith.constant 0 : i32
    return %c0_i32, %c0_i32_0 : i32, i32
  }
  func.func @transform_4(%arg0: i32) -> (i32, i32) {
    %c0_i32 = arith.constant 0 : i32
    %c0_i32_0 = arith.constant 0 : i32
    %c0_i32_1 = arith.constant 0 : i32
    return %c0_i32, %c0_i32_0 : i32, i32
  }
  func.func @transform_5(%arg0: i32) -> (i32, i32) {
    %c0_i32 = arith.constant 0 : i32
    %c0_i32_0 = arith.constant 0 : i32
    %c0_i32_1 = arith.constant 0 : i32
    return %c0_i32, %c0_i32_0 : i32, i32
  }
  func.func @transform_6(%arg0: i32) -> (i32, i32) {
    %c0_i32 = arith.constant 0 : i32
    %c0_i32_0 = arith.constant 0 : i32
    %c0_i32_1 = arith.constant 0 : i32
    return %c0_i32, %c0_i32_0 : i32, i32
  }
  func.func @transform_7(%arg0: i32) -> (i32, i32) {
    %c0_i32 = arith.constant 0 : i32
    %c0_i32_0 = arith.constant 0 : i32
    %c0_i32_1 = arith.constant 0 : i32
    return %c0_i32, %c0_i32_0 : i32, i32
  }
  func.func @transform_8(%arg0: i32) -> (i32, i32) {
    %c0_i32 = arith.constant 0 : i32
    %c0_i32_0 = arith.constant 0 : i32
    %c0_i32_1 = arith.constant 0 : i32
    return %c0_i32, %c0_i32_0 : i32, i32
  }
  func.func @transform_9(%arg0: i32) -> (i32, i32) {
    %c0_i32 = arith.constant 0 : i32
    %c0_i32_0 = arith.constant 0 : i32
    return %arg0, %c0_i32 : i32, i32
  }
}

</mosaic_0001>

<bundles_post_ra>
// kernel: critic_forward.1
= control target key start
LH: loop header
LB: loop body
LE: loop exit
PB: predicated region body
PF: predicated region fallthrough
CT: control target
= control target key end

     0   :  { %14 = vsyncpa [#allocation3], 0  ;;  %s1330_s0 = inlined_call_operand.vmem [shape: f32[8,32], index: 0, kind: input, shape index: {}]   ;;  %s1331_s1 = inlined_call_operand.hbm [shape: bf16[32,512], index: 1, kind: input, shape index: {}]   ;;  %s1332_s2 = inlined_call_operand.hbm [shape: f32[1,512], index: 2, kind: input, shape index: {}]   ;;  %s1333_s3 = inlined_call_operand.hbm [shape: bf16[512,128], index: 3, kind: input, shape index: {}]   ;;  %s1334_s4 = inlined_call_operand.vmem [shape: f32[1,128], index: 4, kind: input, shape index: {}]   ;;  %s1335_s5 = inlined_call_operand.hbm [shape: bf16[128,128], index: 5, kind: input, shape index: {}]   ;;  %s1336_s6 = inlined_call_operand.vmem [shape: f32[1,128], index: 6, kind: input, shape index: {}]   ;;  %s1337_s7 = inlined_call_operand.vmem [shape: bf16[128,128], index: 7, kind: input, shape index: {}]   ;;  %s1338_s8 = inlined_call_operand.vmem [shape: f32[1,128], index: 8, kind: input, shape index: {}]   ;;  %s1339_s9 = inlined_call_operand.vmem [shape: f32[8,128], index: 9, kind: output, shape index: {}]  }
   0x1   :  { %15 = vsyncpa [#allocation5], 0 }
   0x2   :  { %16 = vsyncpa [#allocation8], 0  ;;  %s1157_s30 = smov [#allocation4]   ;;  %s1158_s11 = smov [#allocation2]  }
   0x3   :  { %s37_s10 = sshll.u32 %s1157_s30, 4  ;;  %s24_s12 = sshll.u32 %s1158_s11, 4  ;;  %s38_s10 = int_to_ptr.vmem [resolvable:$true] %s37_s10  ;;  %s1218_s12 = int_to_ptr.vmem [resolvable:$true] %s24_s12 }
   0x4   :  { %s1063_s15 = scalar_lea.hbm %s1332_s2, 64 }
   0x5   :  { %p1064_p0 = scmp.ne.s32.totalorder %s1332_s2, %s1063_s15  ;;  %p1067_p1 = scmp.lt.u32.totalorder %s1063_s15, %s1332_s2 }
   0x7   :  { %p1069_p2 = pnand %p1067_p1, %p1064_p0 }
   0x9   :  { %1072 = shalt.err (!%p1069_p2)
}
   0xa   :  { %s1073_s20 = scalar_lea.vmem %s38_s10, 64  ;;  %p1078_p4 = scmp.lt.s32.totalorder %s38_s10, %s38_s10 }
   0xb   :  { %p1074_p3 = scmp.ne.s32.totalorder %s38_s10, %s1073_s20  ;;  %p1079_p5 = scmp.lt.s32.totalorder %s1073_s20, %s1073_s20 }
   0xd   :  { %p1080_p6 = por %p1079_p5, %p1078_p4 }
   0xf   :  { %p1081_p7 = pnand %p1080_p6, %p1074_p3 }
  0x11   :  { %1084 = shalt.err (!%p1081_p7)
}
  0x12   :  { %40 = dma.hbm_to_vmem [thread:$0]  %s1332_s2, 64, %s38_s10, [#allocation5]  }
  0x13   :  { %s1085_s25 = scalar_lea.hbm %s1331_s1, 1024 }
  0x14   :  { %p1086_p8 = scmp.ne.s32.totalorder %s1331_s1, %s1085_s25  ;;  %p1089_p9 = scmp.lt.u32.totalorder %s1085_s25, %s1331_s1 }
  0x16   :  { %p1091_p10 = pnand %p1089_p9, %p1086_p8 }
  0x18   :  { %1094 = shalt.err (!%p1091_p10)
}
  0x19   :  { %s1095_s30 = scalar_lea.vmem %s1218_s12, 1024  ;;  %p1100_p12 = scmp.lt.s32.totalorder %s1218_s12, %s1218_s12 }
  0x1a   :  { %p1096_p11 = scmp.ne.s32.totalorder %s1218_s12, %s1095_s30  ;;  %p1101_p13 = scmp.lt.s32.totalorder %s1095_s30, %s1095_s30 }
  0x1c   :  { %p1102_p0 = por %p1101_p13, %p1100_p12 }
  0x1e   :  { %p1103_p1 = pnand %p1102_p0, %p1096_p11 }
  0x20   :  { %1106 = shalt.err (!%p1103_p1)
}
  0x21   :  { %s1159_s2 = smov 256   ;;  %s1160_s10 = smov 16  }
  0x22   :  { %30 = dma.hbm_to_vmem [thread:$0]  %s1331_s1, 1024, %s1218_s12, [#allocation3], %s1159_s2, %s1159_s2, %s1160_s10  }
  0x23   :  { %s1161_s14 = smov [#allocation6]   ;;  %s1107_s18 = scalar_lea.hbm %s1333_s3, 4096 }
  0x24   :  { %s46_s15 = sshll.u32 %s1161_s14, 4  ;;  %p1108_p2 = scmp.ne.s32.totalorder %s1333_s3, %s1107_s18  ;;  %s47_s15 = int_to_ptr.vmem [resolvable:$true] %s46_s15 }
  0x25   :  { %p1111_p3 = scmp.lt.u32.totalorder %s1107_s18, %s1333_s3 }
  0x27   :  { %p1113_p4 = pnand %p1111_p3, %p1108_p2 }
  0x29   :  { %1116 = shalt.err (!%p1113_p4)
}
  0x2a   :  { %s1117_s23 = scalar_lea.vmem %s47_s15, 4096  ;;  %p1122_p6 = scmp.lt.s32.totalorder %s47_s15, %s47_s15 }
  0x2b   :  { %p1118_p5 = scmp.ne.s32.totalorder %s47_s15, %s1117_s23  ;;  %p1123_p7 = scmp.lt.s32.totalorder %s1117_s23, %s1117_s23 }
  0x2d   :  { %p1124_p8 = por %p1123_p7, %p1122_p6 }
  0x2f   :  { %p1125_p9 = pnand %p1124_p8, %p1118_p5 }
  0x31   :  { %1128 = shalt.err (!%p1125_p9)
}
  0x32   :  { %s1162_s1 = smov 64   ;;  %s1163_s12 = smov 4  }
  0x33   :  { %52 = dma.hbm_to_vmem [thread:$0]  %s1333_s3, 4096, %s47_s15, [#allocation5], %s1162_s1, %s1162_s1, %s1163_s12  }
  0x34   :  { %s1164_s26 = smov [#allocation7]   ;;  %s1129_s30 = scalar_lea.hbm %s1335_s5, 1024 }
  0x35   :  { %s60_s27 = sshll.u32 %s1164_s26, 4  ;;  %p1130_p10 = scmp.ne.s32.totalorder %s1335_s5, %s1129_s30  ;;  %s61_s27 = int_to_ptr.vmem [resolvable:$true] %s60_s27 }
  0x36   :  { %p1133_p11 = scmp.lt.u32.totalorder %s1129_s30, %s1335_s5 }
  0x38   :  { %p1135_p12 = pnand %p1133_p11, %p1130_p10 }
  0x3a   :  { %1138 = shalt.err (!%p1135_p12)
}
  0x3b   :  { %s1139_s14 = scalar_lea.vmem %s61_s27, 1024  ;;  %p1144_p0 = scmp.lt.s32.totalorder %s61_s27, %s61_s27 }
  0x3c   :  { %p1140_p13 = scmp.ne.s32.totalorder %s61_s27, %s1139_s14  ;;  %p1145_p1 = scmp.lt.s32.totalorder %s1139_s14, %s1139_s14 }
  0x3e   :  { %p1146_p2 = por %p1145_p1, %p1144_p0 }
  0x40   :  { %p1147_p3 = pnand %p1146_p2, %p1140_p13 }
  0x42   :  { %1150 = shalt.err (!%p1147_p3)
}
  0x43   :  { %66 = dma.hbm_to_vmem [thread:$0]  %s1335_s5, 1024, %s61_s27, [#allocation8], %s1162_s1, %s1162_s1, %s1163_s12  }
  0x44   :  { %1151 = dma.done.wait [#allocation3], 1024  }
  0x45   :  { %1152 = vsyncadd [#allocation3], 4294966272 }
  0x46   :  { %1153 = dma.done.wait [#allocation5], 4160  }
  0x47   :  { %1154 = vsyncadd [#allocation5], 4294963136 }
  0x48   :  { %1155 = dma.done.wait [#allocation8], 1024  }
  0x49   :  { %1156 = vsyncadd [#allocation8], 4294966272  ;;  %v1165_v0 = vmov 0   ;;  %v1003_v1 = vld [vmem:[#allocation2 + $0x4] ss:$16 sps:$4 sm:$0xff]   ;;  %vm158_vm0 = vcmask 261120   ;;  %v98_v44 = vlaneseq }
  0x4a   :  { %194 = vmatprep.mubr.bf16.mxu0 %v1165_v0  ;;  %235 = vmatprep.mubr.bf16.mxu1 %v1165_v0  ;;  %v1005_v2 = vld [vmem:[#allocation2 + $0xc] ss:$16 sps:$4 sm:$0xff]   ;;  %v1007_v3 = vld [vmem:[#allocation2] ss:$16 sps:$4 sm:$0xff]   ;;  %v1008_v4 = vld [vmem:[#allocation2 + $0x8] ss:$16 sps:$4 sm:$0xff]  }
  0x4b   :  { %162 = vmatprep.subr.bf16.mxu0 %v1003_v1  ;;  %203 = vmatprep.subr.bf16.mxu1 %v1005_v2  ;;  %v1009_v5 = vld [vmem:[#allocation2 + $0x24] ss:$16 sps:$4 sm:$0xff]   ;;  %v1011_v6 = vld [vmem:[#allocation2 + $0x2c] ss:$16 sps:$4 sm:$0xff]   ;;  %v1013_v7 = vld [vmem:[#allocation2 + $0x20] ss:$16 sps:$4 sm:$0xff]  }
  0x4c   :  { %163 = vmatpush1.bf16.msra.mxu0 %v1007_v3  ;;  %204 = vmatpush1.bf16.msra.mxu1 %v1008_v4  ;;  %v1014_v8 = vld [vmem:[#allocation2 + $0x28] ss:$16 sps:$4 sm:$0xff]   ;;  %v86_v9 = vld [vmem:[%s1330_s0] sm:$0xff]  ;;  %v1019_v15 = vld [vmem:[#allocation6 + $0x48] sm:$0xff]   ;;  %v1166_v43 = vmov 0.0   ;;  %v99_v45 = vshrl.u32 %v98_v44, 7 }
  0x4d   :  { %164 = vmatprep.subr.bf16.mxu0 %v1009_v5  ;;  %205 = vmatprep.subr.bf16.mxu1 %v1011_v6  ;;  %v1015_v10 = vld [vmem:[#allocation6 + $0x40] sm:$0xff]   ;;  %v87_v11 = vpack.c.bf16 %v86_v9, %v86_v9  ;;  %v1020_v16 = vld [vmem:[#allocation6 + $0xc8] sm:$0xff]   ;;  %v1023_v19 = vld [vmem:[#allocation6 + $0x50] sm:$0xff]   ;;  %vm1167_vm1 = vmmov 0  }
  0x4e   :  { %v1016_v12 = vld [vmem:[#allocation6 + $0xc0] sm:$0xff]   ;;  %v1021_v17 = vld [vmem:[#allocation6 + $0x8] sm:$0xff]   ;;  %v1024_v20 = vld [vmem:[#allocation6 + $0xd0] sm:$0xff]   ;;  %v100_v46 = vsub.s32 0, %v99_v45  ;;  %v108_v47 = vsub.s32 2, %v99_v45  ;;  %v104_v49 = vsub.s32 1, %v99_v45 }
  0x4f   :  { %v1017_v13 = vld [vmem:[#allocation6] sm:$0xff]   ;;  %v1022_v18 = vld [vmem:[#allocation6 + $0x88] sm:$0xff]   ;;  %v1025_v21 = vld [vmem:[#allocation6 + $0x10] sm:$0xff]   ;;  %v112_v50 = vsub.s32 3, %v99_v45 }
  0x50   :  { %165 = vmatpush1.bf16.msra.mxu0 %v1013_v7  ;;  %206 = vmatpush1.bf16.msra.mxu1 %v1014_v8  ;;  %v1018_v14 = vld [vmem:[#allocation6 + $0x80] sm:$0xff]   ;;  %v1026_v22 = vld [vmem:[#allocation6 + $0x90] sm:$0xff]   ;;  %v1027_v23 = vld [vmem:[#allocation6 + $0x58] sm:$0xff]  }
  0x51   :  { %890 = vmatprep.subr.bf16.mxu0 %v1015_v10  ;;  %912 = vmatprep.subr.bf16.mxu1 %v1016_v12  ;;  %v1028_v24 = vld [vmem:[#allocation6 + $0xd8] sm:$0xff]   ;;  %v1031_v27 = vld [vmem:[#allocation6 + $0x60] sm:$0xff]   ;;  %v1035_v31 = vld [vmem:[#allocation6 + $0x68] sm:$0xff]  }
  0x52   :  { %v1029_v25 = vld [vmem:[#allocation6 + $0x18] sm:$0xff]   ;;  %v1032_v28 = vld [vmem:[#allocation6 + $0xe0] sm:$0xff]   ;;  %v1036_v32 = vld [vmem:[#allocation6 + $0xe8] sm:$0xff]  }
  0x53   :  { %837 = vmatmul.mubr.msk.bf16.vlgmr.msra.gmra.mrb[0].mxu0 %vm158_vm0, %v87_v11  ;;  %838 = vmatmul.mubr.msk.bf16.vlgmr.msra.gmra.mrb[0].mxu1 %vm158_vm0, %v87_v11  ;;  %v1030_v26 = vld [vmem:[#allocation6 + $0x98] sm:$0xff]   ;;  %v1033_v29 = vld [vmem:[#allocation6 + $0x20] sm:$0xff]   ;;  %v1037_v33 = vld [vmem:[#allocation6 + $0x28] sm:$0xff]  }
  0x54   :  { %891 = vmatpush3.bf16.msra.mxu0 %v1017_v13  ;;  %913 = vmatpush3.bf16.msra.mxu1 %v1018_v14  ;;  %v1034_v30 = vld [vmem:[#allocation6 + $0xa0] sm:$0xff]   ;;  %v1038_v34 = vld [vmem:[#allocation6 + $0xa8] sm:$0xff]   ;;  %v1039_v35 = vld [vmem:[#allocation6 + $0x70] sm:$0xff]  }
  0x55   :  { %892 = vmatprep.subr.bf16.mxu0 %v1019_v15  ;;  %914 = vmatprep.subr.bf16.mxu1 %v1020_v16  ;;  %v1040_v36 = vld [vmem:[#allocation6 + $0xf0] sm:$0xff]   ;;  %v1043_v39 = vld [vmem:[#allocation6 + $0x78] sm:$0xff]   ;;  %v1047_v10 = vld [vmem:[#allocation7] sm:$0xff]  }
  0x56   :  { %v1041_v37 = vld [vmem:[#allocation6 + $0x30] sm:$0xff]   ;;  %v1044_v40 = vld [vmem:[#allocation6 + $0xf8] sm:$0xff]   ;;  %v1048_v12 = vld [vmem:[#allocation7 + $0x8] sm:$0xff]  }
  0x57   :  { %v1042_v38 = vld [vmem:[#allocation6 + $0xb0] sm:$0xff]   ;;  %v1045_v41 = vld [vmem:[#allocation6 + $0x38] sm:$0xff]   ;;  %v1051_v15 = vld [vmem:[#allocation7 + $0x20] sm:$0xff]  }
  0x58   :  { %893 = vmatpush3.bf16.msra.mxu0 %v1021_v17  ;;  %915 = vmatpush3.bf16.msra.mxu1 %v1022_v18  ;;  %v1046_v42 = vld [vmem:[#allocation6 + $0xb8] sm:$0xff]   ;;  %v1049_v13 = vld [vmem:[#allocation7 + $0x10] sm:$0xff]   ;;  %v1052_v16 = vld [vmem:[#allocation7 + $0x28] sm:$0xff]  }
  0x59   :  { %894 = vmatprep.subr.bf16.mxu0 %v1023_v19  ;;  %916 = vmatprep.subr.bf16.mxu1 %v1024_v20  ;;  %v96_v48 = vld [vmem:[#allocation4] sm:$0xf]  ;;  %v1053_v17 = vld [vmem:[#allocation7 + $0x30] sm:$0xff]   ;;  %v1056_v20 = vld [vmem:[%s1337_s7 + $0x8] sm:$0xff]  }
  0x5a   :  { %v101_v51 = vrot.slane %v96_v48, %v100_v46  ;;  %v109_v52 = vrot.slane %v96_v48, %v108_v47  ;;  %v105_v53 = vrot.slane %v96_v48, %v104_v49  ;;  %v113_v54 = vrot.slane %v96_v48, %v112_v50  ;;  %v1050_v14 = vld [vmem:[#allocation7 + $0x18] sm:$0xff]  }
  0x5b   :  { %v1054_v18 = vld [vmem:[#allocation7 + $0x38] sm:$0xff]  }
  0x5c   :  { %895 = vmatpush3.bf16.msra.mxu0 %v1025_v21  ;;  %917 = vmatpush3.bf16.msra.mxu1 %v1026_v22  ;;  %v1055_v19 = vld [vmem:[%s1337_s7] sm:$0xff]   ;;  %v1057_v21 = vld [vmem:[%s1337_s7 + $0x10] sm:$0xff]   ;;  %v1058_v22 = vld [vmem:[%s1337_s7 + $0x18] sm:$0xff]  }
  0x5d   :  { %896 = vmatprep.subr.bf16.mxu0 %v1027_v23  ;;  %918 = vmatprep.subr.bf16.mxu1 %v1028_v24  ;;  %v1059_v23 = vld [vmem:[%s1337_s7 + $0x20] sm:$0xff]   ;;  %v1060_v24 = vld [vmem:[%s1337_s7 + $0x28] sm:$0xff]  }
  0x60   :  { %897 = vmatpush3.bf16.msra.mxu0 %v1029_v25  ;;  %919 = vmatpush3.bf16.msra.mxu1 %v1030_v26 }
  0x61   :  { %898 = vmatprep.subr.bf16.mxu0 %v1031_v27  ;;  %920 = vmatprep.subr.bf16.mxu1 %v1032_v28  ;;  %v839_v27 = vld [vmem:[%s1334_s4] ss:$0 sm:$0xff] }
  0x64   :  { %899 = vmatpush3.bf16.msra.mxu0 %v1033_v29  ;;  %921 = vmatpush3.bf16.msra.mxu1 %v1034_v30 }
  0x65   :  { %900 = vmatprep.subr.bf16.mxu0 %v1035_v31  ;;  %922 = vmatprep.subr.bf16.mxu1 %v1036_v32 }
  0x68   :  { %901 = vmatpush3.bf16.msra.mxu0 %v1037_v33  ;;  %923 = vmatpush3.bf16.msra.mxu1 %v1038_v34 }
  0x69   :  { %902 = vmatprep.subr.bf16.mxu0 %v1039_v35  ;;  %924 = vmatprep.subr.bf16.mxu1 %v1040_v36 }
  0x6c   :  { %903 = vmatpush3.bf16.msra.mxu0 %v1041_v37  ;;  %925 = vmatpush3.bf16.msra.mxu1 %v1042_v38 }
  0x6d   :  { %904 = vmatprep.subr.bf16.mxu0 %v1043_v39  ;;  %926 = vmatprep.subr.bf16.mxu1 %v1044_v40  ;;  %v1061_v40 = vld [vmem:[%s1337_s7 + $0x30] sm:$0xff]  }
  0x70   :  { %905 = vmatpush3.bf16.msra.mxu0 %v1045_v41  ;;  %927 = vmatpush3.bf16.msra.mxu1 %v1046_v42  ;;  %v1062_v41 = vld [vmem:[%s1337_s7 + $0x38] sm:$0xff]   ;;  %v872_v42 = vld [vmem:[%s1336_s6] ss:$0 sm:$0xff] }
  0x71   :  { %952 = vmatprep.subr.bf16.mxu0 %v1166_v43  ;;  %972 = vmatprep.subr.bf16.mxu1 %v1166_v43 }
 0x126   :  { %v196_v55 = vpop.f32.mrb[0].mxu0  ;;  %v237_v56 = vpop.f32.mrb[0].mxu1 }
 0x127   :  { %v197_v57 = vadd.f32 %v196_v55, %v101_v51  ;;  %v238_v58 = vadd.f32 %v237_v56, %v109_v52  ;;  %v198_v59 = vpop.f32.mrb[1].mxu0  ;;  %v239_v60 = vpop.f32.mrb[1].mxu1 }
 0x128   :  { %v199_v61 = vadd.f32 %v198_v59, %v105_v53  ;;  %v240_v62 = vadd.f32 %v239_v60, %v113_v54  ;;  %v200_v63 = vpop.f32.mrb[2].mxu0  ;;  %v241_v0 = vpop.f32.mrb[2].mxu1 }
 0x129   :  { %v244_v1 = vmax.f32 %v197_v57, 0.0  ;;  %v246_v2 = vmax.f32 %v238_v58, 0.0  ;;  %v201_v3 = vpop.f32.mrb[3].mxu0  ;;  %v242_v4 = vpop.f32.mrb[3].mxu1 }
 0x12a   :  { %v245_v5 = vmax.f32 %v199_v61, 0.0  ;;  %v247_v6 = vmax.f32 %v240_v62, 0.0 }
 0x12b   :  { %v250_v7 = vpack.c.bf16 %v246_v2, %v246_v2  ;;  %v248_v11 = vpack.c.bf16 %v244_v1, %v244_v1 }
 0x12c   :  { %v249_v8 = vpack.c.bf16 %v245_v5, %v245_v5  ;;  %v251_v9 = vpack.c.bf16 %v247_v6, %v247_v6 }
 0x12e   :  { %547 = vmatprep.mubr.bf16.mxu0 %v249_v8  ;;  %587 = vmatprep.mubr.bf16.mxu1 %v251_v9 }
 0x12f   :  { %548 = vmatmul.mubr.bf16.vlgmr.msra.gmra.mrb[4].mxu0 %v248_v11  ;;  %588 = vmatmul.mubr.bf16.vlgmr.msra.gmra.mrb[4].mxu1 %v250_v7 }
 0x130   :  { %953 = vmatpush3.bf16.msra.mxu0 %v1047_v10  ;;  %968 = vmatprep.mubr.msk.bf16.mxu0 %vm1167_vm1, %v1166_v43 }
 0x131   :  { %954 = vmatprep.subr.bf16.mxu0 %v1166_v43  ;;  %988 = vmatprep.mubr.msk.bf16.mxu1 %vm1167_vm1, %v1166_v43 }
 0x132   :  { %973 = vmatpush3.bf16.msra.mxu1 %v1055_v19 }
 0x133   :  { %974 = vmatprep.subr.bf16.mxu1 %v1166_v43 }
 0x134   :  { %955 = vmatpush3.bf16.msra.mxu0 %v1048_v12 }
 0x135   :  { %956 = vmatprep.subr.bf16.mxu0 %v1166_v43 }
 0x136   :  { %975 = vmatpush3.bf16.msra.mxu1 %v1056_v20 }
 0x137   :  { %976 = vmatprep.subr.bf16.mxu1 %v1166_v43 }
 0x138   :  { %957 = vmatpush3.bf16.msra.mxu0 %v1049_v13 }
 0x139   :  { %958 = vmatprep.subr.bf16.mxu0 %v1166_v43 }
 0x13a   :  { %977 = vmatpush3.bf16.msra.mxu1 %v1057_v21 }
 0x13b   :  { %978 = vmatprep.subr.bf16.mxu1 %v1166_v43 }
 0x13c   :  { %959 = vmatpush3.bf16.msra.mxu0 %v1050_v14 }
 0x13d   :  { %960 = vmatprep.subr.bf16.mxu0 %v1166_v43 }
 0x13e   :  { %979 = vmatpush3.bf16.msra.mxu1 %v1058_v22 }
 0x13f   :  { %980 = vmatprep.subr.bf16.mxu1 %v1166_v43 }
 0x140   :  { %961 = vmatpush3.bf16.msra.mxu0 %v1051_v15 }
 0x141   :  { %962 = vmatprep.subr.bf16.mxu0 %v1166_v43 }
 0x142   :  { %981 = vmatpush3.bf16.msra.mxu1 %v1059_v23 }
 0x143   :  { %982 = vmatprep.subr.bf16.mxu1 %v1166_v43 }
 0x144   :  { %963 = vmatpush3.bf16.msra.mxu0 %v1052_v16 }
 0x145   :  { %964 = vmatprep.subr.bf16.mxu0 %v1166_v43 }
 0x146   :  { %983 = vmatpush3.bf16.msra.mxu1 %v1060_v24 }
 0x147   :  { %984 = vmatprep.subr.bf16.mxu1 %v1166_v43 }
 0x148   :  { %965 = vmatpush3.bf16.msra.mxu0 %v1053_v17 }
 0x149   :  { %966 = vmatprep.subr.bf16.mxu0 %v1166_v43 }
 0x14a   :  { %985 = vmatpush3.bf16.msra.mxu1 %v1061_v40 }
 0x14b   :  { %986 = vmatprep.subr.bf16.mxu1 %v1166_v43  ;;  %v881_v43 = vld [vmem:[%s1338_s8] ss:$0 sm:$0xff] }
 0x14c   :  { %967 = vmatpush3.bf16.msra.mxu0 %v1054_v18 }
 0x14e   :  { %987 = vmatpush3.bf16.msra.mxu1 %v1062_v41 }
 0x202   :  { %v906_v25 = vpop.f32.mrb[4].mxu0  ;;  %v928_v26 = vpop.f32.mrb[4].mxu1 }
 0x203   :  { %v907_v28 = vpop.f32.mrb[5].mxu0  ;;  %v929_v29 = vpop.f32.mrb[5].mxu1 }
 0x204   :  { %v908_v30 = vadd.f32 %v907_v28, %v906_v25  ;;  %v930_v31 = vadd.f32 %v929_v29, %v928_v26  ;;  %v909_v32 = vpop.f32.mrb[6].mxu0  ;;  %v931_v33 = vpop.f32.mrb[6].mxu1 }
 0x205   :  { %v910_v34 = vpop.f32.mrb[7].mxu0  ;;  %v932_v35 = vpop.f32.mrb[7].mxu1 }
 0x206   :  { %v550_v36 = vadd.f32 %v908_v30, %v839_v27 }
 0x208   :  { %v590_v37 = vadd.f32 %v930_v31, %v550_v36 }
 0x20a   :  { %v595_v38 = vmax.f32 %v590_v37, 0.0 }
 0x20c   :  { %v596_v39 = vpack.c.bf16 %v595_v38, %v595_v38 }
 0x20e   :  { %969 = vmatmul.mubr.bf16.vlgmr.msra.gmra.mrb[8].mxu0 %v596_v39 }
 0x2e1   :  { %v702_v44 = vpop.f32.mrb[8].mxu0 }
 0x2e2   :  { %v703_v45 = vadd.f32 %v872_v42, %v702_v44  ;;  %v970_v46 = vpop.f32.mrb[9].mxu0 }
 0x2e3   :  { %v705_v47 = vpop.f32.mrb[10].mxu0 }
 0x2e4   :  { %v708_v48 = vmax.f32 %v703_v45, 0.0  ;;  %v971_v49 = vpop.f32.mrb[11].mxu0 }
 0x2e6   :  { %v709_v50 = vpack.c.bf16 %v708_v48, %v708_v48 }
 0x2e8   :  { %989 = vmatmul.mubr.bf16.vlgmr.msra.gmra.mrb[8].mxu1 %v709_v50 }
 0x3bb   :  { %v815_v51 = vpop.f32.mrb[8].mxu1 }
 0x3bc   :  { %v816_v52 = vadd.f32 %v881_v43, %v815_v51  ;;  %v990_v53 = vpop.f32.mrb[9].mxu1 }
 0x3bd   :  { %v818_v54 = vpop.f32.mrb[10].mxu1 }
 0x3be   :  { %821 = vst [vmem:[%s1339_s9] sm:$0xff] %v816_v52  ;;  %v991_v55 = vpop.f32.mrb[11].mxu1 }
 0x3bf   :  { %826 = vsyncpa [#allocation3], 1 }
 0x3c0   :  { %827 = vsyncpa [#allocation5], 1 }
 0x3c1   :  { %828 = vsyncpa [#allocation8], 1 }

</bundles_post_ra>
